<compile_context>
chip_gen: v7x
topology: tpu7x:2x2x1
jax: 0.10.0
libtpu: 0.0.40
codegen_flags: <defaults>
</compile_context>

<pallas_src>
import math
import functools

import jax
import jax.numpy as jnp
from jax import lax
from jax.experimental import pallas as pl
from jax.experimental.pallas import tpu as pltpu


def _round_up(a, m):
    return (a + m - 1) // m * m


def _self_attention_kernel(*refs, q_tile, compute_dtype, has_bias):
    if has_bias:
        (bias_ref, x_ref, wq_ref, bq_ref, wk_ref, bk_ref, wv_ref, bv_ref,
         out_ref, probs_ref, k_sc, v_sc) = refs
    else:
        (x_ref, wq_ref, bq_ref, wk_ref, bk_ref, wv_ref, bv_ref,
         out_ref, probs_ref, k_sc, v_sc) = refs
        bias_ref = None

    qi = pl.program_id(1)

    # ---- per-batch prologue: project K and V once, keep resident in VMEM ----
    # (Q is projected per query tile below -> no Q scratch / (S,3D) temp.)
    @pl.when(qi == 0)
    def _():
        xf = x_ref[0].astype(compute_dtype)                        # (S, E)
        k_sc[...] = (jnp.dot(xf, wk_ref[...],
                             preferred_element_type=jnp.float32)
                     + bk_ref[...]).astype(k_sc.dtype)             # (S, D)
        v_sc[...] = (jnp.dot(xf, wv_ref[...],
                             preferred_element_type=jnp.float32)
                     + bv_ref[...]).astype(v_sc.dtype)             # (S, D)

    # ---- Q projection for this query tile (weights resident, scale folded) --
    row0 = pl.multiple_of(qi * q_tile, q_tile)
    x_t = x_ref[0, pl.ds(row0, q_tile), :].astype(compute_dtype)   # (TQ, E)
    q_t = (jnp.dot(x_t, wq_ref[...], preferred_element_type=jnp.float32)
           + bq_ref[...])                                          # (TQ, D) f32

    # ---- attention scores: contract on D of both operands (no K transpose) --
    scores = lax.dot_general(
        q_t.astype(compute_dtype), k_sc[...],
        dimension_numbers=(((1,), (1,)), ((), ())),
        preferred_element_type=jnp.float32)                        # (TQ, S) f32

    if has_bias:
        # additive mask bias: 0 where kept, -inf where mask == 0 / padded key.
        scores = scores + bias_ref[0].astype(jnp.float32)

    # numerically stable softmax; exact denominator so probs rows sum to 1.
    # Fully-masked rows give NaN, matching torch masked_fill + softmax.
    m = jnp.max(scores, axis=-1, keepdims=True)
    e = jnp.exp(scores - m)
    denom = jnp.sum(e, axis=-1, keepdims=True)
    probs = e * (1.0 / denom)                                      # (TQ, S) f32

    out = jnp.dot(probs.astype(compute_dtype), v_sc[...],
                  preferred_element_type=jnp.float32)              # (TQ, D) f32

    out_ref[0] = out.astype(out_ref.dtype)
    probs_ref[0] = probs.astype(probs_ref.dtype)


def self_attention(x, params, mask=None, *, q_tile=None,
                   compute_dtype=jnp.float32, probs_dtype=None):
    """Forward pass of the PyTorch SelfAttention module.

    x      : [B, S, E]
    params : nn.Linear params: wq/wk/wv [D, E] (out, in), bq/bk/bv [D]
    mask   : None, [S, S], [1, S, S] or [B, S, S]; positions where mask == 0
             get -inf before the softmax (torch masked_fill semantics).
    compute_dtype : MXU operand dtype. bfloat16 is recommended for throughput
             on all generations (v5e/v6e/v7x MXUs accumulate in f32);
             float32 (default) gives bit-closer parity with the torch module.
    probs_dtype : dtype of the returned attn_probas (default x.dtype). bf16
             halves the dominant O(S^2) HBM writeback if downstream allows.
    Returns (out [B, S, D], attn_probas [B, S, S]).
    """
    B, S, E = x.shape
    D = params["wq"].shape[0]
    scale = 1.0 / math.sqrt(E)
    probs_dt = x.dtype if probs_dtype is None else probs_dtype

    # --- generation-aware tiling / VMEM budget -------------------------------
    try:
        vmem_phys = int(pltpu.get_tpu_info().vmem_capacity_bytes)
    except Exception:
        vmem_phys = 64 * 1024 * 1024           # conservative (v7x per-core)
    row_cap = 512 if vmem_phys >= (100 << 20) else 128

    if q_tile is None:
        q_tile = min(_round_up(S, 8), row_cap)
    q_tile = max(8, _round_up(int(q_tile), 8))
    S_pad = _round_up(S, q_tile)               # never a full S x S fallback
    n_q = S_pad // q_tile
    pad = S_pad - S

    # --- host-side prep: transpose weights, fold score scale into Q ----------
    ct = compute_dtype
    wq_s = (params["wq"].T * scale).astype(ct)            # (E, D)
    wk_t = params["wk"].T.astype(ct)                      # (E, D)
    wv_t = params["wv"].T.astype(ct)                      # (E, D)
    bq_s = (params["bq"] * scale).reshape(1, D).astype(jnp.float32)
    bk_b = params["bk"].reshape(1, D).astype(jnp.float32)
    bv_b = params["bv"].reshape(1, D).astype(jnp.float32)

    x_p = x if pad == 0 else jnp.pad(x, ((0, 0), (0, pad), (0, 0)))

    # Additive mask bias (bf16, never B-broadcast): 0 keep / -inf drop; padded
    # key columns are always dropped. Only materialized when needed.
    has_bias = (mask is not None) or (pad > 0)
    if has_bias:
        if mask is not None:
            m3 = mask if mask.ndim == 3 else mask[None]
            keep = (m3 != 0)
            keep = jnp.pad(keep, ((0, 0), (0, pad), (0, pad)),
                           constant_values=True)
        else:
            keep = jnp.ones((1, S_pad, S_pad), dtype=bool)
        col_ok = (jnp.arange(S_pad) < S)[None, None, :]
        keep = jnp.logical_and(keep, col_ok)
        bias = jnp.where(keep, 0.0, float("-inf")).astype(jnp.bfloat16)
        Bm = bias.shape[0]

    # --- specs ----------------------------------------------------------------
    in_specs = []
    args = []
    if has_bias:
        if Bm == 1:
            bias_map = lambda b, q: (0, q, 0)     # shared slab, no B blowup
        else:
            bias_map = lambda b, q: (b, q, 0)
        in_specs.append(pl.BlockSpec((1, q_tile, S_pad), bias_map))
        args.append(bias)
    in_specs += [
        # x: constant block index along the query-tile axis -> DMA'd once per
        # batch element, stays resident for its whole inner loop.
        pl.BlockSpec((1, S_pad, E), lambda b, q: (b, 0, 0)),
        # weights / biases: constant index -> resident for the whole call.
        pl.BlockSpec((E, D), lambda b, q: (0, 0)),
        pl.BlockSpec((1, D), lambda b, q: (0, 0)),
        pl.BlockSpec((E, D), lambda b, q: (0, 0)),
        pl.BlockSpec((1, D), lambda b, q: (0, 0)),
        pl.BlockSpec((E, D), lambda b, q: (0, 0)),
        pl.BlockSpec((1, D), lambda b, q: (0, 0)),
    ]
    args += [x_p, wq_s, bq_s, wk_t, bk_b, wv_t, bv_b]

    out_specs = (
        pl.BlockSpec((1, q_tile, D), lambda b, q: (b, q, 0)),       # out
        pl.BlockSpec((1, q_tile, S_pad), lambda b, q: (b, q, 0)),   # probas
    )

    # --- VMEM budget -> explicit, generation-safe vmem_limit_bytes ------------
    it_c = jnp.dtype(ct).itemsize
    it_x = jnp.dtype(x.dtype).itemsize
    it_p = jnp.dtype(probs_dt).itemsize
    budget = (
        2 * S_pad * E * it_x                          # x block (double-buffered)
        + 2 * 3 * (E * D * it_c + D * 4)              # weights + biases
        + 2 * S_pad * D * it_c                        # K / V scratch
        + 2 * q_tile * D * it_x                       # out block
        + 2 * q_tile * S_pad * it_p                   # probs block
        + (2 * q_tile * S_pad * 2 if has_bias else 0) # bf16 bias block
        + 6 * q_tile * S_pad * 4                      # f32 softmax temporaries
        + 2 * q_tile * E * 4 + 2 * q_tile * D * 4     # Q-tile temporaries
    )
    vmem_limit = min(max(budget + (8 << 20), 32 << 20), int(vmem_phys * 0.8))

    cost = pl.CostEstimate(
        flops=2 * B * S_pad * E * 3 * D + 4 * B * S_pad * S_pad * D,
        transcendentals=B * S_pad * S_pad,
        bytes_accessed=(x_p.size * it_x + 3 * E * D * it_c + 3 * D * 4
                        + (bias.size * 2 if has_bias else 0)
                        + B * S_pad * D * it_x + B * S_pad * S_pad * it_p),
    )

    kernel = functools.partial(
        _self_attention_kernel,
        q_tile=q_tile, compute_dtype=ct, has_bias=has_bias)

    out, probs = pl.pallas_call(
        kernel,
        out_shape=(
            jax.ShapeDtypeStruct((B, S_pad, D), x.dtype),
            jax.ShapeDtypeStruct((B, S_pad, S_pad), probs_dt),
        ),
        grid_spec=pltpu.PrefetchScalarGridSpec(
            num_scalar_prefetch=0,
            grid=(B, n_q),
            in_specs=in_specs,
            out_specs=out_specs,
            scratch_shapes=[
                pltpu.VMEM((S_pad, D), ct),   # K cache (per-batch resident)
                pltpu.VMEM((S_pad, D), ct),   # V cache
            ],
        ),
        compiler_params=pltpu.CompilerParams(
            # batch axis parallel (megacore); query-tile axis sequential
            # because it reuses the per-batch K/V scratch + qi==0 prologue.
            # TODO(synk): when B < num_cores, split the query-tile axis across
            # TensorCores (K/V recomputed per core) for single-batch long-S.
            dimension_semantics=("parallel", "arbitrary"),
            vmem_limit_bytes=int(vmem_limit),
        ),
        cost_estimate=cost,
    )(*args)

    if pad:
        out = out[:, :S, :]
        probs = probs[:, :S, :S]
    return out, probs


def _reference(x, params, mask):
    """Pure-JAX reference mirroring the PyTorch forward."""
    E = x.shape[-1]
    q = x @ params["wq"].T + params["bq"]
    k = x @ params["wk"].T + params["bk"]
    v = x @ params["wv"].T + params["bv"]
    scores = jnp.einsum("bqd,bkd->bqk", q, k) / math.sqrt(E)
    if mask is not None:
        scores = jnp.where(mask == 0, float("-inf"), scores)
    probs = jax.nn.softmax(scores, axis=-1)
    out = jnp.einsum("bqk,bkd->bqd", probs, v)
    return out, probs


if __name__ == "__main__":
    B, S, E, D = 2, 16, 32, 16

    key = jax.random.PRNGKey(0)
    kx, kwq, kwk, kwv, kbq, kbk, kbv = jax.random.split(key, 7)

    x = jax.random.normal(kx, (B, S, E), dtype=jnp.float32)
    bound = 1.0 / math.sqrt(E)
    params = {
        "wq": jax.random.uniform(kwq, (D, E), jnp.float32, -bound, bound),
        "wk": jax.random.uniform(kwk, (D, E), jnp.float32, -bound, bound),
        "wv": jax.random.uniform(kwv, (D, E), jnp.float32, -bound, bound),
        "bq": jax.random.uniform(kbq, (D,), jnp.float32, -bound, bound),
        "bk": jax.random.uniform(kbk, (D,), jnp.float32, -bound, bound),
        "bv": jax.random.uniform(kbv, (D,), jnp.float32, -bound, bound),
    }
    causal = jnp.tril(jnp.ones((S, S), dtype=jnp.int32))

    # 1) mask=None, f32 operands, single query tile
    out, probs = self_attention(x, params, mask=None)
    jax.block_until_ready((out, probs))
    out_r, probs_r = _reference(x, params, None)
    assert out.shape == (B, S, D) and probs.shape == (B, S, S)
    assert jnp.allclose(out, out_r, atol=5e-3, rtol=5e-3)
    assert jnp.allclose(probs, probs_r, atol=5e-3, rtol=5e-3)

    # 2) causal mask via shared (1,S,S) bf16 additive bias, two query tiles
    out_m, probs_m = self_attention(x, params, mask=causal, q_tile=8)
    jax.block_until_ready((out_m, probs_m))
    out_mr, probs_mr = _reference(x, params, causal)
    assert jnp.allclose(out_m, out_mr, atol=5e-3, rtol=5e-3)
    assert jnp.allclose(probs_m, probs_mr, atol=5e-3, rtol=5e-3)

    # 3) bf16 MXU operands (recommended throughput path), f32 accumulation
    out_b, probs_b = self_attention(x, params, mask=causal, q_tile=8,
                                    compute_dtype=jnp.bfloat16)
    jax.block_until_ready((out_b, probs_b))
    assert jnp.allclose(out_b, out_mr, atol=7e-2, rtol=7e-2)
    assert jnp.allclose(probs_b, probs_mr, atol=7e-2, rtol=7e-2)

    # 4) non-divisible S -> padded sequence + in-kernel pad-key masking
    x2 = x[:, :12, :]
    causal2 = causal[:12, :12]
    out_p, probs_p = self_attention(x2, params, mask=causal2)
    jax.block_until_ready((out_p, probs_p))
    out_pr, probs_pr = _reference(x2, params, causal2)
    assert out_p.shape == (B, 12, D) and probs_p.shape == (B, 12, 12)
    assert jnp.allclose(out_p, out_pr, atol=5e-3, rtol=5e-3)
    assert jnp.allclose(probs_p, probs_pr, atol=5e-3, rtol=5e-3)

    print("KERNEL_OK")
</pallas_src>

<mosaic_0001>
module attributes {stable_mosaic.version = 11 : i64} {
  func.func @_self_attention_kernel(%arg0: i32, %arg1: i32, %arg2: memref<1x16x32xf32, #tpu.memory_space<vmem>>, %arg3: memref<32x16xf32, #tpu.memory_space<vmem>>, %arg4: memref<1x16xf32, #tpu.memory_space<vmem>>, %arg5: memref<32x16xf32, #tpu.memory_space<vmem>>, %arg6: memref<1x16xf32, #tpu.memory_space<vmem>>, %arg7: memref<32x16xf32, #tpu.memory_space<vmem>>, %arg8: memref<1x16xf32, #tpu.memory_space<vmem>>, %arg9: memref<1x16x16xf32, #tpu.memory_space<vmem>>, %arg10: memref<1x16x16xf32, #tpu.memory_space<vmem>>, %arg11: memref<16x16xf32, #tpu.memory_space<vmem>>, %arg12: memref<16x16xf32, #tpu.memory_space<vmem>>) attributes {dimension_semantics = [#tpu.dimension_semantics<parallel>, #tpu.dimension_semantics<arbitrary>], iteration_bounds = array<i64: 2, 1>, scalar_prefetch = 0 : i64, scratch_operands = 2 : i64, tpu.core_type = #tpu.core_type<tc>, window_params = [{transform_indices = @transform_0, window_bounds = array<i64: 1, 16, 32>}, {pipeline_mode = #tpu.pipeline_mode<synchronous>, transform_indices = @transform_1, window_bounds = array<i64: 32, 16>}, {pipeline_mode = #tpu.pipeline_mode<synchronous>, transform_indices = @transform_2, window_bounds = array<i64: 1, 16>}, {pipeline_mode = #tpu.pipeline_mode<synchronous>, transform_indices = @transform_3, window_bounds = array<i64: 32, 16>}, {pipeline_mode = #tpu.pipeline_mode<synchronous>, transform_indices = @transform_4, window_bounds = array<i64: 1, 16>}, {pipeline_mode = #tpu.pipeline_mode<synchronous>, transform_indices = @transform_5, window_bounds = array<i64: 32, 16>}, {pipeline_mode = #tpu.pipeline_mode<synchronous>, transform_indices = @transform_6, window_bounds = array<i64: 1, 16>}, {transform_indices = @transform_7, window_bounds = array<i64: 1, 16, 16>}, {transform_indices = @transform_8, window_bounds = array<i64: 1, 16, 16>}]} {
    %c0_i32 = arith.constant 0 : i32
    %0 = arith.cmpi eq, %arg1, %c0_i32 : i32
    %1 = arith.extui %0 : i1 to i32
    %c0_i32_0 = arith.constant 0 : i32
    %2 = arith.cmpi ne, %1, %c0_i32_0 : i32
    scf.if %2 {
      %c0_21 = arith.constant 0 : index
      %c0_22 = arith.constant 0 : index
      %c0_23 = arith.constant 0 : index
      %34 = vector.load %arg2[%c0_21, %c0_22, %c0_23] : memref<1x16x32xf32, #tpu.memory_space<vmem>>, vector<1x16x32xf32>
      %35 = vector.shape_cast %34 : vector<1x16x32xf32> to vector<16x32xf32>
      %c0_24 = arith.constant 0 : index
      %c0_25 = arith.constant 0 : index
      %36 = vector.load %arg5[%c0_24, %c0_25] : memref<32x16xf32, #tpu.memory_space<vmem>>, vector<32x16xf32>
      %cst_26 = arith.constant dense<0.000000e+00> : vector<16x16xf32>
      %37 = tpu.matmul %35, %36, %cst_26 {dimension_numbers = #tpu.dot_dimension_numbers<[1], [0], [0], [1], [0, 0, 1, 1], [], []>} : vector<16x32xf32>, vector<32x16xf32>, vector<16x16xf32> -> vector<16x16xf32>
      %c0_27 = arith.constant 0 : index
      %c0_28 = arith.constant 0 : index
      %38 = vector.load %arg6[%c0_27, %c0_28] : memref<1x16xf32, #tpu.memory_space<vmem>>, vector<1x16xf32>
      %39 = vector.broadcast %38 : vector<1x16xf32> to vector<16x16xf32>
      %40 = arith.addf %37, %39 : vector<16x16xf32>
      %c0_29 = arith.constant 0 : index
      %c0_30 = arith.constant 0 : index
      %41 = vector.load %arg11[%c0_29, %c0_30] : memref<16x16xf32, #tpu.memory_space<vmem>>, vector<16x16xf32>
      tpu.vector_store %arg11[%c0_29, %c0_30], %40 {strides = array<i32>} : memref<16x16xf32, #tpu.memory_space<vmem>>, vector<16x16xf32>,
      %c0_31 = arith.constant 0 : index
      %c0_32 = arith.constant 0 : index
      %42 = vector.load %arg7[%c0_31, %c0_32] : memref<32x16xf32, #tpu.memory_space<vmem>>, vector<32x16xf32>
      %cst_33 = arith.constant dense<0.000000e+00> : vector<16x16xf32>
      %43 = tpu.matmul %35, %42, %cst_33 {dimension_numbers = #tpu.dot_dimension_numbers<[1], [0], [0], [1], [0, 0, 1, 1], [], []>} : vector<16x32xf32>, vector<32x16xf32>, vector<16x16xf32> -> vector<16x16xf32>
      %c0_34 = arith.constant 0 : index
      %c0_35 = arith.constant 0 : index
      %44 = vector.load %arg8[%c0_34, %c0_35] : memref<1x16xf32, #tpu.memory_space<vmem>>, vector<1x16xf32>
      %45 = vector.broadcast %44 : vector<1x16xf32> to vector<16x16xf32>
      %46 = arith.addf %43, %45 : vector<16x16xf32>
      %c0_36 = arith.constant 0 : index
      %c0_37 = arith.constant 0 : index
      %47 = vector.load %arg12[%c0_36, %c0_37] : memref<16x16xf32, #tpu.memory_space<vmem>>, vector<16x16xf32>
      tpu.vector_store %arg12[%c0_36, %c0_37], %46 {strides = array<i32>} : memref<16x16xf32, #tpu.memory_space<vmem>>, vector<16x16xf32>,
    } else {
    }
    %c16_i32 = arith.constant 16 : i32
    %3 = arith.muli %arg1, %c16_i32 : i32
    %4 = tpu.assume_multiple %3, 16 : i32
    %c0 = arith.constant 0 : index
    %5 = arith.index_cast %4 : i32 to index
    %c0_1 = arith.constant 0 : index
    %6 = vector.load %arg2[%c0, %5, %c0_1] : memref<1x16x32xf32, #tpu.memory_space<vmem>>, vector<1x16x32xf32>
    %7 = vector.shape_cast %6 : vector<1x16x32xf32> to vector<16x32xf32>
    %c0_2 = arith.constant 0 : index
    %c0_3 = arith.constant 0 : index
    %8 = vector.load %arg3[%c0_2, %c0_3] : memref<32x16xf32, #tpu.memory_space<vmem>>, vector<32x16xf32>
    %cst = arith.constant dense<0.000000e+00> : vector<16x16xf32>
    %9 = tpu.matmul %7, %8, %cst {dimension_numbers = #tpu.dot_dimension_numbers<[1], [0], [0], [1], [0, 0, 1, 1], [], []>} : vector<16x32xf32>, vector<32x16xf32>, vector<16x16xf32> -> vector<16x16xf32>
    %c0_4 = arith.constant 0 : index
    %c0_5 = arith.constant 0 : index
    %10 = vector.load %arg4[%c0_4, %c0_5] : memref<1x16xf32, #tpu.memory_space<vmem>>, vector<1x16xf32>
    %11 = vector.broadcast %10 : vector<1x16xf32> to vector<16x16xf32>
    %12 = arith.addf %9, %11 : vector<16x16xf32>
    %c0_6 = arith.constant 0 : index
    %c0_7 = arith.constant 0 : index
    %13 = vector.load %arg11[%c0_6, %c0_7] : memref<16x16xf32, #tpu.memory_space<vmem>>, vector<16x16xf32>
    %cst_8 = arith.constant dense<0.000000e+00> : vector<16x16xf32>
    %14 = tpu.matmul %12, %13, %cst_8 {dimension_numbers = #tpu.dot_dimension_numbers<[1], [1], [0], [0], [0, 0, 1, 0], [], []>} : vector<16x16xf32>, vector<16x16xf32>, vector<16x16xf32> -> vector<16x16xf32>
    %cst_9 = arith.constant dense<0xFF800000> : vector<16xf32>
    %15 = vector.multi_reduction <maximumf>, %14, %cst_9 [1] : vector<16x16xf32> to vector<16xf32>
    %16 = vector.shape_cast %15 : vector<16xf32> to vector<16x1xf32>
    %17 = vector.broadcast %16 : vector<16x1xf32> to vector<16x16xf32>
    %18 = arith.subf %14, %17 : vector<16x16xf32>
    %19 = math.exp %18 : vector<16x16xf32>
    %cst_10 = arith.constant dense<0.000000e+00> : vector<16xf32>
    %20 = vector.multi_reduction <add>, %19, %cst_10 [1] : vector<16x16xf32> to vector<16xf32>
    %21 = vector.shape_cast %20 : vector<16xf32> to vector<16x1xf32>
    %cst_11 = arith.constant 1.000000e+00 : f32
    %22 = vector.broadcast %cst_11 : f32 to vector<16x1xf32>
    %23 = arith.divf %22, %21 : vector<16x1xf32>
    %24 = vector.broadcast %23 : vector<16x1xf32> to vector<16x16xf32>
    %25 = arith.mulf %19, %24 : vector<16x16xf32>
    %c0_12 = arith.constant 0 : index
    %c0_13 = arith.constant 0 : index
    %26 = vector.load %arg12[%c0_12, %c0_13] : memref<16x16xf32, #tpu.memory_space<vmem>>, vector<16x16xf32>
    %cst_14 = arith.constant dense<0.000000e+00> : vector<16x16xf32>
    %27 = tpu.matmul %25, %26, %cst_14 {dimension_numbers = #tpu.dot_dimension_numbers<[1], [0], [0], [1], [0, 0, 1, 1], [], []>} : vector<16x16xf32>, vector<16x16xf32>, vector<16x16xf32> -> vector<16x16xf32>
    %c0_15 = arith.constant 0 : index
    %c0_16 = arith.constant 0 : index
    %c0_17 = arith.constant 0 : index
    %28 = vector.load %arg9[%c0_15, %c0_16, %c0_17] : memref<1x16x16xf32, #tpu.memory_space<vmem>>, vector<1x16x16xf32>
    %29 = vector.shape_cast %28 : vector<1x16x16xf32> to vector<16x16xf32>
    %30 = vector.shape_cast %27 : vector<16x16xf32> to vector<1x16x16xf32>
    tpu.vector_store %arg9[%c0_15, %c0_16, %c0_17], %30 {strides = array<i32>} : memref<1x16x16xf32, #tpu.memory_space<vmem>>, vector<1x16x16xf32>,
    %c0_18 = arith.constant 0 : index
    %c0_19 = arith.constant 0 : index
    %c0_20 = arith.constant 0 : index
    %31 = vector.load %arg10[%c0_18, %c0_19, %c0_20] : memref<1x16x16xf32, #tpu.memory_space<vmem>>, vector<1x16x16xf32>
    %32 = vector.shape_cast %31 : vector<1x16x16xf32> to vector<16x16xf32>
    %33 = vector.shape_cast %25 : vector<16x16xf32> to vector<1x16x16xf32>
    tpu.vector_store %arg10[%c0_18, %c0_19, %c0_20], %33 {strides = array<i32>} : memref<1x16x16xf32, #tpu.memory_space<vmem>>, vector<1x16x16xf32>,
    return
  }
  func.func @transform_0(%arg0: i32, %arg1: i32) -> (i32, i32, i32) {
    %c0_i32 = arith.constant 0 : i32
    %c0_i32_0 = arith.constant 0 : i32
    %c0_i32_1 = arith.constant 0 : i32
    return %arg0, %c0_i32, %c0_i32_0 : i32, i32, i32
  }
  func.func @transform_1(%arg0: i32, %arg1: i32) -> (i32, i32) {
    %c0_i32 = arith.constant 0 : i32
    %c0_i32_0 = arith.constant 0 : i32
    %c0_i32_1 = arith.constant 0 : i32
    return %c0_i32, %c0_i32_0 : i32, i32
  }
  func.func @transform_2(%arg0: i32, %arg1: i32) -> (i32, i32) {
    %c0_i32 = arith.constant 0 : i32
    %c0_i32_0 = arith.constant 0 : i32
    %c0_i32_1 = arith.constant 0 : i32
    return %c0_i32, %c0_i32_0 : i32, i32
  }
  func.func @transform_3(%arg0: i32, %arg1: i32) -> (i32, i32) {
    %c0_i32 = arith.constant 0 : i32
    %c0_i32_0 = arith.constant 0 : i32
    %c0_i32_1 = arith.constant 0 : i32
    return %c0_i32, %c0_i32_0 : i32, i32
  }
  func.func @transform_4(%arg0: i32, %arg1: i32) -> (i32, i32) {
    %c0_i32 = arith.constant 0 : i32
    %c0_i32_0 = arith.constant 0 : i32
    %c0_i32_1 = arith.constant 0 : i32
    return %c0_i32, %c0_i32_0 : i32, i32
  }
  func.func @transform_5(%arg0: i32, %arg1: i32) -> (i32, i32) {
    %c0_i32 = arith.constant 0 : i32
    %c0_i32_0 = arith.constant 0 : i32
    %c0_i32_1 = arith.constant 0 : i32
    return %c0_i32, %c0_i32_0 : i32, i32
  }
  func.func @transform_6(%arg0: i32, %arg1: i32) -> (i32, i32) {
    %c0_i32 = arith.constant 0 : i32
    %c0_i32_0 = arith.constant 0 : i32
    %c0_i32_1 = arith.constant 0 : i32
    return %c0_i32, %c0_i32_0 : i32, i32
  }
  func.func @transform_7(%arg0: i32, %arg1: i32) -> (i32, i32, i32) {
    %c0_i32 = arith.constant 0 : i32
    %c0_i32_0 = arith.constant 0 : i32
    return %arg0, %arg1, %c0_i32 : i32, i32, i32
  }
  func.func @transform_8(%arg0: i32, %arg1: i32) -> (i32, i32, i32) {
    %c0_i32 = arith.constant 0 : i32
    %c0_i32_0 = arith.constant 0 : i32
    return %arg0, %arg1, %c0_i32 : i32, i32, i32
  }
}

</mosaic_0001>

<bundles_post_ra>
// kernel: tpu_custom_call.1
= control target key start
LH: loop header
LB: loop body
LE: loop exit
PB: predicated region body
PF: predicated region fallthrough
CT: control target
= control target key end

     0   :  { %s1575_s0 = inlined_call_operand.vmem [shape: f32[2,16,32], index: 0, kind: input, shape index: {}]   ;;  %s1576_s1 = inlined_call_operand.vmem [shape: f32[32,16], index: 1, kind: input, shape index: {}]   ;;  %s1577_s2 = inlined_call_operand.vmem [shape: f32[1,16], index: 2, kind: input, shape index: {}]   ;;  %s1578_s3 = inlined_call_operand.vmem [shape: f32[32,16], index: 3, kind: input, shape index: {}]   ;;  %s1579_s4 = inlined_call_operand.vmem [shape: f32[1,16], index: 4, kind: input, shape index: {}]   ;;  %s1580_s5 = inlined_call_operand.vmem [shape: f32[32,16], index: 5, kind: input, shape index: {}]   ;;  %s1581_s6 = inlined_call_operand.vmem [shape: f32[1,16], index: 6, kind: input, shape index: {}]   ;;  %s1582_s7 = inlined_call_operand.hbm [shape: f32[2,16,16], index: 7, kind: output, shape index: {0}]   ;;  %s1583_s8 = inlined_call_operand.hbm [shape: f32[2,16,16], index: 8, kind: output, shape index: {1}]  }
   0x1   :  { %1586 = sst [smem:[#allocation10_spill]] %s1575_s0 }
   0x2   :  { %14 = vsyncpa [#allocation5], 0 }
   0x3   :  { %16 = vsyncpa [#allocation5 + $0x1], 0 }
   0x4   :  { %17 = vsyncpa [#allocation7], 0 }
   0x5   :  { %19 = vsyncpa [#allocation7 + $0x1], 0  ;;  %s1343_s27 = smov 0   ;;  %s1345_s28 = smov 0  }
   0x6   :  { %s1347_s29 = smov 0   ;;  %s1349_s30 = smov 0  }
   0x7   :  { %s1351_s9 = smov 0   ;;  %s1353_s10 = smov 0  }
   0x8 LB: > { %s970_s11 = sadd.s32 4294967295, %s1292_s10   ;;  %s971_s12 = sadd.s32 4294967294, %s1292_s10   ;;  %s1292_s10 = sphi %s1353_s10, %s25_s10   ;;  %s1288_s9 = sphi %s1351_s9, %s1596_s9   ;;  %s1284_s30 = sphi %s1349_s30, %s1595_s30   ;;  %s1280_s29 = sphi %s1347_s29, %s1594_s29   ;;  %s1276_s28 = sphi %s1345_s28, %s1593_s28   ;;  %s1272_s27 = sphi %s1343_s27, %s1592_s27  }
   0x9   : > { %s37_s13 = sadd.s32 1, %s1288_s9  ;;  %s198_s14 = sadd.s32 1, %s1280_s29 }
   0xa   : > { %p39_p0 = scmp.ge.s32.totalorder %s37_s13, 2  ;;  %p208_p1 = scmp.ne.s32.totalorder %s1280_s29, %s1276_s28 }
   0xb   : > { %p209_p2 = scmp.eq.s32.totalorder %s970_s11, 1  ;;  %p214_p3 = scmp.ne.s32.totalorder %s1276_s28, %s1272_s27 }
   0xc   : > { %s1598_s13 = smov (%p39_p0, %s37_s13), 0  ;;  %p215_p5 = scmp.eq.s32.totalorder %s971_s12, 1 }
   0xd   : > { %p1383_p4 = por %p209_p2, %p208_p1  ;;  %s193_s16 = ssub.s32 %s1288_s9, %s1598_s13 }
   0xe   : > { %p974_p6 = scmp.ge.s32.totalorder %s1292_s10, 1  ;;  %p196_p7 = scmp.eq.s32.totalorder %s193_s16, 0 }
   0xf   : > { %p1390_p8 = por %p215_p5, %p214_p3  ;;  %p287_p9 = scmp.lt.s32.totalorder %s1292_s10, 3 }
  0x10   : > { %s1396_s18 = scalar_select %p196_p7, %s1280_s29, %s198_s14  }
  0x11   : > { %p288_p10 = pnand %p974_p6, %p287_p9 }
  0x12   : > { %v339_v0 = vld [vmem:[%s1578_s3] sm:$0xff] (!%p288_p10)  ;;  %v340_v1 = vld [vmem:[%s1578_s3 + $0x8] sm:$0xff] (!%p288_p10)  ;;  %v341_v2 = vld [vmem:[%s1578_s3 + $0x10] sm:$0xff] (!%p288_p10)  ;;  %p326_p11 = scmp.lt.s32.totalorder (!%p288_p10), %s1284_s30, 1  ;;  %vm350_vm0 = vcmask (!%p288_p10), 261120   ;;  %s1589_s0 = sld [smem:[#allocation10_spill]] (!%p288_p10) }
  0x13   : > { %291 = sbr.rel (%p288_p10) target bundleno = 1023 (0x3ff), region = 48  ;;  %v1078_v3 = vpack.c.bf16 (!%p288_p10), %v340_v1, %v339_v0  ;;  %v342_v4 = vld [vmem:[%s1578_s3 + $0x18] sm:$0xff] (!%p288_p10)  ;;  %v527_v6 = vld [vmem:[%s1576_s1] sm:$0xff] (!%p288_p10)  ;;  %v528_v7 = vld [vmem:[%s1576_s1 + $0x8] sm:$0xff] (!%p288_p10)  ;;  %vm432_vm1 = vcmask (!%p288_p10), 130048   ;;  %s1467_s16 = sand.u32 (!%p288_p10), 1, %s1276_s28  }
  0x14   : > { %v1082_v5 = vpack.c.bf16 (!%p288_p10), %v342_v4, %v341_v2  ;;  %v1094_v8 = vpack.c.bf16 (!%p288_p10), %v528_v7, %v527_v6  ;;  %v529_v10 = vld [vmem:[%s1576_s1 + $0x10] sm:$0xff] (!%p288_p10)  ;;  %v530_v11 = vld [vmem:[%s1576_s1 + $0x18] sm:$0xff] (!%p288_p10)  ;;  %v435_v14 = vld [vmem:[%s1580_s5] sm:$0xff] (!%p288_p10)  ;;  %s1585_s19 = sshll.u32 (!%p288_p10), %s1467_s16, 4  ;;  %s1584_s22 = sshll.u32 (!%p288_p10), %s1284_s30, 8 }
  0x15   : > { %1079 = vmatprep.subr.bf16.mxu0 (!%p288_p10), %v1078_v3  ;;  %v1098_v13 = vpack.c.bf16 (!%p288_p10), %v530_v11, %v529_v10  ;;  %v436_v15 = vld [vmem:[%s1580_s5 + $0x8] sm:$0xff] (!%p288_p10)  ;;  %v437_v17 = vld [vmem:[%s1580_s5 + $0x10] sm:$0xff] (!%p288_p10)  ;;  %v438_v18 = vld [vmem:[%s1580_s5 + $0x18] sm:$0xff] (!%p288_p10)  ;;  %s1484_s25 = scalar_lea.hbm (!%p288_p10), %s1583_s8, %s1584_s22  ;;  %s827_s26 = scalar_lea.sflag (!%p288_p10), [#allocation7], %s1467_s16 }
  0x16   : > { %1081 = vmatpush3.bf16.msra.mxu0 (!%p288_p10), %v1078_v3  ;;  %v1086_v16 = vpack.c.bf16 (!%p288_p10), %v436_v15, %v435_v14  ;;  %v1090_v19 = vpack.c.bf16 (!%p288_p10), %v438_v18, %v437_v17  ;;  %v979_v20 = vld [vmem:[%s1579_s4] ss:$0 sm:$0xff] (!%p288_p10)  ;;  %vm1103_vm2 = vmpackc.low (!%p288_p10), %vm432_vm1, %vm432_vm1 }
  0x17   : > { %1083 = vmatprep.subr.bf16.mxu0 (!%p288_p10), %v1082_v5  ;;  %v985_v25 = vld [vmem:[%s1577_s2] ss:$0 sm:$0xff] (!%p288_p10) }
  0x18   : > { %1087 = vmatprep.subr.bf16.mxu1 (!%p288_p10), %v1086_v16  ;;  %v982_v33 = vld [vmem:[%s1581_s6] ss:$0 sm:$0xff] (!%p288_p10) }
  0x19   : > { %1089 = vmatpush3.bf16.msra.mxu1 (!%p288_p10), %v1086_v16 }
  0x1a   : > { %s327_s11 = scalar_select %p326_p11, %s1284_s30, 1  ;;  %1085 = vmatpush3.bf16.msra.mxu0 %v1082_v5  ;;  %1091 = vmatprep.subr.bf16.mxu1 %v1090_v19 }
  0x1b   : > { %1095 = vmatprep.subr.bf16.mxu0 %v1094_v8 }
  0x1c   : > { %s1002_s20 = sshll.u32 %s327_s11, 4  ;;  %s1294_s11 = smov [#allocation6]  }
  0x1d   : > { %s330_s23 = scalar_lea.vmem %s1589_s0, %s1002_s20  ;;  %1093 = vmatpush3.bf16.msra.mxu1 %v1090_v19  ;;  %s325_s20 = scalar_lea.vmem [#allocation6], %s1585_s19 }
  0x1e   : > { %v337_v9 = vld [vmem:[%s330_s23] sm:$0xff]  ;;  %v338_v12 = vld [vmem:[%s330_s23 + $0x8] sm:$0xff]  ;;  %s860_s21 = sshll.u32 %s325_s20, 4  ;;  %s1186_s14 = sshll.u32 %s1294_s11, 4  ;;  %s1476_s21 = int_to_ptr.vmem [resolvable:$true] %s860_s21  ;;  %s1187_s14 = int_to_ptr.vmem [resolvable:$false] %s1186_s14 }
  0x1f   : > { %1039 = vmatprep.mubr.msk.f32.mxu0 %vm350_vm0, %v337_v9  ;;  %1050 = vmatprep.mubr.msk.f32.mxu1 %vm350_vm0, %v337_v9  ;;  %s1182_s12 = scalar_lea.vmem %s1476_s21, 256  ;;  %p1189_p1 = scmp.lt.s32.totalorder %s1476_s21, %s1187_s14 }
  0x20   : > { %1040 = vmatmul.mubr.msk.f32.vlgmr.msra.gmra.mrb[0].mxu0 %vm350_vm0, %v338_v12  ;;  %1051 = vmatmul.mubr.msk.f32.vlgmr.msra.gmra.mrb[0].mxu1 %vm350_vm0, %v338_v12  ;;  %p1183_p12 = scmp.ne.s32.totalorder %s1476_s21, %s1182_s12 }
  0x21   : > { %1097 = vmatpush3.bf16.msra.mxu0 %v1094_v8  ;;  %1061 = vmatprep.mubr.msk.f32.mxu0 %vm350_vm0, %v337_v9 }
  0x22   : > { %1099 = vmatprep.subr.bf16.mxu0 %v1098_v13  ;;  %p1184_p13 = pnand %p1183_p12, %p1383_p4 }
  0x24   : > { %p1185_p0 = pneg %p1184_p13 }
  0x25   : > { %1101 = vmatpush3.bf16.msra.mxu0 %v1098_v13 }
  0x28   : > { %1062 = vmatmul.mubr.msk.f32.vlgmr.msra.gmra.mrb[2].mxu0 %vm350_vm0, %v338_v12 }
  0xf3   : > { %v1041_v21 = vpop.f32.mrb[0].mxu0  ;;  %v1052_v34 = vpop.f32.mrb[0].mxu1 }
  0xf4   : > { %v429_v22 = vadd.f32 %v1041_v21, %v979_v20  ;;  %v423_v23 = vpop.f32.mrb[1].mxu0  ;;  %v518_v35 = vadd.f32 %v1052_v34, %v982_v33  ;;  %v512_v36 = vpop.f32.mrb[1].mxu1 }
  0xf5   : > { %v424_v24 = vadd.f32 %v979_v20, %v423_v23  ;;  %v513_v37 = vadd.f32 %v982_v33, %v512_v36 }
  0xf6   : > { %434 = vst.msk [vmem:[#allocation2 + $0x8] sm:$0xff] %vm432_vm1, %v429_v22  ;;  %522 = vst.msk [vmem:[#allocation3 + $0x8] sm:$0xff] %vm432_vm1, %v518_v35 }
  0xf7   : > { %433 = vst.msk [vmem:[#allocation2] sm:$0xff] %vm432_vm1, %v424_v24  ;;  %521 = vst.msk [vmem:[#allocation3] sm:$0xff] %vm432_vm1, %v513_v37 }
  0xfb   : > { %v1063_v26 = vpop.f32.mrb[2].mxu0 }
  0xfc   : > { %v611_v27 = vpop.f32.mrb[3].mxu0  ;;  %v617_v32 = vadd.f32 %v1063_v26, %v985_v25 }
  0xfd   : > { %v621_v28 = vld [vmem:[#allocation2 + $0x8] sm:$0xff]  ;;  %v612_v29 = vadd.f32 %v985_v25, %v611_v27  ;;  %v735_v39 = vld [vmem:[#allocation3 + $0x8] sm:$0xff] }
  0xfe   : > { %v620_v30 = vld [vmem:[#allocation2] sm:$0xff]  ;;  %v734_v38 = vld [vmem:[#allocation3] sm:$0xff] }
  0xff   : > { %v1102_v31 = vpack.c.bf16 %v621_v28, %v620_v30  ;;  %1068 = vmatprep.mubr.msk.f32.mxu1 %vm432_vm1, %v612_v29  ;;  %v1108_v40 = vpack.c.bf16 %v735_v39, %v734_v38 }
 0x101   : > { %1104 = vmatprep.subr.msk.bf16.mxu1 %vm1103_vm2, %v1102_v31  ;;  %1109 = vmatprep.subr.bf16.mxu0 %v1108_v40 }
 0x102   : > { %1107 = vmatpush3.bf16.xpose.msk.msra.mxu1 %vm1103_vm2, %v1102_v31  ;;  %1111 = vmatpush3.bf16.msra.mxu0 %v1108_v40 }
 0x109   : > { %1069 = vmatmul.mubr.msk.f32.vlgmr.msra.gmra.mrb[2].mxu1 %vm432_vm1, %v617_v32 }
 0x1dc   : > { %v1070_v41 = vpop.f32.mrb[2].mxu1 }
 0x1dd   : > { %v701_v42 = vpop.f32.mrb[3].mxu1  ;;  %v713_v44 = vsel %vm432_vm1, %v1070_v41, -inf }
 0x1de   : > { %v710_v43 = vsel %vm432_vm1, %v701_v42, -inf }
 0x1df   : > { %711 = vmax.xlane.f32.xlu0 %v710_v43 }
 0x1e3   : > { %714 = vmax.xlane.f32.xlu0 %v713_v44 }
 0x26c   : > { %v712_v45 = vpop.xlane.xlu0 %711 }
 0x26d   : > { %v716_v46 = vsub.f32 %v701_v42, %v712_v45 }
 0x26f   : > { %v718_v47 = vmul.f32 1.442695, %v716_v46 }
 0x270   : > { %v715_v48 = vpop.xlane.xlu0 %714 }
 0x271   : > { %1174 = vpow2.f32 %v718_v47  ;;  %v717_v49 = vsub.f32 %v1070_v41, %v715_v48 }
 0x273   : > { %v720_v50 = vmul.f32 1.442695, %v717_v49 }
 0x275   : > { %1176 = vpow2.f32 %v720_v50 }
 0x27b   : > { %v1175_v51 = vpop.eup %1174 }
 0x27c   : > { %v722_v52 = vsel %vm432_vm1, %v1175_v51, 0.0 }
 0x27d   : > { %723 = vadd.xlane.f32.xlu1 %v722_v52 }
 0x27f   : > { %v1177_v53 = vpop.eup %1176 }
 0x280   : > { %v725_v54 = vsel %vm432_vm1, %v1177_v53, 0.0 }
 0x281   : > { %726 = vadd.xlane.f32.xlu1 %v725_v54 }
 0x30a   : > { %v724_v55 = vpop.xlane.xlu1 %723 }
 0x30b   : > { %1178 = vrcp.f32 %v724_v55 }
 0x30e   : > { %v727_v56 = vpop.xlane.xlu1 %726 }
 0x30f   : > { %1180 = vrcp.f32 %v727_v56 }
 0x315   : > { %v1179_v57 = vpop.eup %1178 }
 0x316   : > { %v732_v58 = vmul.f32 %v1179_v57, %v1175_v51 }
 0x318   : > { %1075 = vmatprep.mubr.msk.f32.mxu0 %vm432_vm1, %v732_v58  ;;  %819 = vst.msk [vmem:[%s325_s20] sm:$0xff] %vm432_vm1, %v732_v58 }
 0x319   : > { %v1181_v59 = vpop.eup %1180 }
 0x31a   : > { %v733_v60 = vmul.f32 %v1181_v59, %v1177_v53 }
 0x31c   : > { %1076 = vmatmul.mubr.msk.f32.vlgmr.msra.gmra.mrb[4].mxu0 %vm432_vm1, %v733_v60  ;;  %820 = vst.msk [vmem:[%s325_s20 + $0x8] sm:$0xff] %vm432_vm1, %v733_v60  ;;  %s1188_s20 = scalar_lea.vmem %s1187_s14, 512 }
 0x31d   : > { %p1190_p2 = scmp.lt.s32.totalorder %s1188_s20, %s1182_s12 }
 0x31f   : > { %p1191_p3 = por %p1190_p2, %p1189_p1 }
 0x321   : > { %p1192_p5 = pnand %p1191_p3, %p1185_p0 }
 0x323   : > { %1195 = shalt.err (!%p1192_p5)
}
 0x324   : > { %s1196_s23 = scalar_lea.hbm %s1484_s25, 256  ;;  %s1200_s11 = scalar_lea.hbm %s1583_s8, 512 }
 0x325   : > { %p1197_p6 = scmp.ne.s32.totalorder %s1484_s25, %s1196_s23  ;;  %p1201_p10 = scmp.lt.u32.totalorder %s1484_s25, %s1583_s8 }
 0x326   : > { %p1202_p11 = scmp.lt.u32.totalorder %s1200_s11, %s1196_s23  ;;  %p1204_p13 = scmp.lt.u32.totalorder %s1196_s23, %s1484_s25 }
 0x327   : > { %p1198_p7 = pnand %p1197_p6, %p1383_p4 }
 0x328   : > { %p1203_p12 = por %p1202_p11, %p1201_p10 }
 0x329   : > { %p1199_p9 = pneg %p1198_p7 }
 0x32a   : > { %p1205_p0 = por %p1204_p13, %p1203_p12 }
 0x32c   : > { %p1206_p1 = pnand %p1205_p0, %p1199_p9 }
 0x32e   : > { %1209 = shalt.err (!%p1206_p1)
}
 0x32f   : > { %s1295_s12 = smov 128   ;;  %s1296_s22 = smov 8  }
 0x330   : > { %1113 = dma.vmem_to_hbm [thread:$0]  (%p1383_p4), %s1476_s21, 256, %s1484_s25, %s827_s26, %s1295_s12, %s1295_s12, %s1296_s22  }
 0x331   : > { %s1590_s19 = sshll.u32 %s1467_s16, 4  ;;  %s1591_s24 = sshll.u32 %s1284_s30, 8 }
 0x332   : > { %s318_s20 = scalar_lea.vmem [#allocation4], %s1590_s19  ;;  %s1522_s0 = scalar_lea.hbm %s1582_s7, %s1591_s24 }
 0x333   : > { %s842_s23 = sshll.u32 %s318_s20, 4  ;;  %s822_s21 = scalar_lea.sflag [#allocation5], %s1467_s16  ;;  %s1515_s23 = int_to_ptr.vmem [resolvable:$true] %s842_s23 }
 0x334   : > { %s1210_s25 = scalar_lea.vmem %s1515_s23, 256  ;;  %s1297_s30 = smov [#allocation4]  }
 0x335   : > { %p1211_p2 = scmp.ne.s32.totalorder %s1515_s23, %s1210_s25  ;;  %s1214_s26 = sshll.u32 %s1297_s30, 4  ;;  %s1215_s26 = int_to_ptr.vmem [resolvable:$false] %s1214_s26 }
 0x336   : > { %s1216_s19 = scalar_lea.vmem %s1215_s26, 512  ;;  %p1217_p6 = scmp.lt.s32.totalorder %s1515_s23, %s1215_s26 }
 0x337   : > { %p1212_p3 = pnand %p1211_p2, %p1383_p4  ;;  %p1218_p7 = scmp.lt.s32.totalorder %s1216_s19, %s1210_s25 }
 0x339   : > { %p1213_p5 = pneg %p1212_p3  ;;  %p1219_p9 = por %p1218_p7, %p1217_p6 }
 0x33b   : > { %p1220_p10 = pnand %p1219_p9, %p1213_p5 }
 0x3ef   : > { %v1077_v61 = vpop.f32.mrb[4].mxu0 }
 0x3f0   : > { %818 = vst.msk [vmem:[%s318_s20 + $0x8] sm:$0xff] %vm432_vm1, %v1077_v61  ;;  %v808_v62 = vpop.f32.mrb[5].mxu0 }
 0x3f1   : > { %817 = vst.msk [vmem:[%s318_s20] sm:$0xff] %vm432_vm1, %v808_v62 }
 0x3f2   : > { %1223 = shalt.err (!%p1220_p10)
}
 0x3f3   : > { %s1224_s20 = scalar_lea.hbm %s1522_s0, 256  ;;  %s1228_s14 = scalar_lea.hbm %s1582_s7, 512 }
 0x3f4   : > { %p1225_p11 = scmp.ne.s32.totalorder %s1522_s0, %s1224_s20  ;;  %p1229_p0 = scmp.lt.u32.totalorder %s1522_s0, %s1582_s7 }
 0x3f5   : > { %p1230_p1 = scmp.lt.u32.totalorder %s1228_s14, %s1224_s20  ;;  %p1232_p3 = scmp.lt.u32.totalorder %s1224_s20, %s1522_s0 }
 0x3f6   : > { %p1226_p12 = pnand %p1225_p11, %p1383_p4 }
 0x3f7   : > { %p1231_p2 = por %p1230_p1, %p1229_p0 }
 0x3f8   : > { %p1227_p13 = pneg %p1226_p12 }
 0x3f9   : > { %p1233_p5 = por %p1232_p3, %p1231_p2 }
 0x3fb   : > { %p1234_p6 = pnand %p1233_p5, %p1227_p13 }
 0x3fd   : > { %1237 = shalt.err (!%p1234_p6)
}
 0x3fe   : > { %1112 = dma.vmem_to_hbm [thread:$0]  (%p1383_p4), %s1515_s23, 256, %s1522_s0, %s822_s21, %s1295_s12, %s1295_s12, %s1296_s22  }
 0x3ff PF: > { %p1123_p7 = scmp.ge.s32.totalorder %s1292_s10, 2  ;;  %s875_s25 = sand.u32 1, %s1272_s27  }
 0x400   : > { %s876_s19 = scalar_lea.sflag [#allocation5], %s875_s25 }
 0x401   : > { %p1117_p9 = pnand %p1123_p7, %p1390_p8 }
 0x403   : > { %1263 = dma.done.wait (!%p1117_p9), %s876_s19, 256  }
 0x404   : > { %1265 = vsyncadd (!%p1117_p9), %s876_s19, 4294967040  ;;  %s885_s15 = scalar_lea.sflag [#allocation7], %s875_s25 }
 0x405   : > { %1267 = dma.done.wait (!%p1117_p9), %s885_s15, 256  }
 0x406   : > { %1269 = vsyncadd (!%p1117_p9), %s885_s15, 4294967040  ;;  %s25_s10 = sadd.s32 1, %s1292_s10   ;;  %s1592_s27 = smov %s1276_s28 }
 0x407   : > { %p22_p10 = scmp.ge.s32.totalorder %s25_s10, 4   ;;  %s1593_s28 = smov %s1280_s29 }
 0x408   : > { %s1594_s29 = smov %s1396_s18  ;;  %s1595_s30 = smov %s1288_s9 }
 0x409   : > { %s1596_s9 = smov %s1598_s13  ;;  %24 = sbr.rel (!%p22_p10) target bundleno = 8 (0x8), region = 105 }
 0x410   :  { %890 = vsyncpa [#allocation5], 1 }
 0x411   :  { %892 = vsyncpa [#allocation5 + $0x1], 1 }
 0x412   :  { %893 = vsyncpa [#allocation7], 1 }
 0x413   :  { %895 = vsyncpa [#allocation7 + $0x1], 1 }

</bundles_post_ra>
